<compile_context>
chip_gen: v6e
topology: v6e:2x2x1
jax: 0.10.0
libtpu: 0.0.40
codegen_flags: <defaults>
</compile_context>

<pallas_src>
import functools

import jax
import jax.numpy as jnp
from jax import lax
from jax.experimental import pallas as pl
from jax.experimental.pallas import tpu as pltpu

LN_EPS = 1e-5      # nn.LayerNorm default
SUB_ROWS = 256     # in-kernel sub-block size (rows) for the f32 working set


def _make_kernel(sub_rows, n_sub):
    """Residual-add + LayerNorm over one (row_tile, D) tile, in sub-blocks."""

    def kernel(gamma_ref, beta_ref, x_ref, sub_ref, out_ref):
        D = x_ref.shape[-1]
        inv_d = jnp.float32(1.0 / D)
        g = gamma_ref[...]   # (1, D) f32, VMEM-resident across the grid
        b = beta_ref[...]    # (1, D) f32

        # Static (fully unrolled) sub-block loop: bounds the live f32 'y'
        # temporary to sub_rows rows per step instead of the whole tile.
        for s in range(n_sub):
            r0 = s * sub_rows
            y = (x_ref[pl.ds(r0, sub_rows), :].astype(jnp.float32)
                 + sub_ref[pl.ds(r0, sub_rows), :].astype(jnp.float32))

            # Two-pass statistics (matches torch LayerNorm numerics).
            mean = jnp.sum(y, axis=-1, keepdims=True) * inv_d
            c = y - mean
            var = jnp.sum(c * c, axis=-1, keepdims=True) * inv_d
            inv = lax.rsqrt(var + jnp.float32(LN_EPS))

            out_ref[pl.ds(r0, sub_rows), :] = (c * (inv * g) + b).astype(out_ref.dtype)

    return kernel


def _vmem_capacity_bytes():
    """Trace-time per-TensorCore VMEM capacity, with a conservative fallback."""
    try:
        return int(pltpu.get_tpu_info().vmem_capacity_bytes)
    except Exception:
        return 64 << 20  # v7x-sized default (safe lower bound for v5e/v6e too)


def _pick_row_tile(rows, dim, dtype):
    """Largest row tile such that per-step HBM traffic is multi-MiB and the
    double-buffered working set fits the per-TC VMEM budget."""
    itemsize = jnp.dtype(dtype).itemsize
    pack = max(8, 32 // itemsize)  # sublane pack: 8 f32, 16 bf16, 32 int8/fp8

    vmem_cap = _vmem_capacity_bytes()
    budget = int(vmem_cap * 0.55)
    # Double-buffered x / sub / out in the *input* dtype (no f32 over-count);
    # the in-kernel f32 temporaries are bounded by SUB_ROWS and small.
    io_per_row = 2 * 3 * dim * itemsize
    max_rows_vmem = max(pack, budget // max(io_per_row, 1))

    # Bytes-based target: >= ~12 MiB of HBM traffic per grid step so the
    # ~0.35 us step overhead stays <5% even at v7x's ~3.2 TB/s.
    target_rows = pl.cdiv(12 << 20, 3 * dim * itemsize)

    row_tile = min(2048, max_rows_vmem, max(target_rows, pack))

    # Never larger than the (pack-rounded) problem itself.
    rows_rounded = ((rows + pack - 1) // pack) * pack
    row_tile = min(row_tile, rows_rounded)

    # Align so the in-kernel sub-block loop divides evenly.
    if row_tile >= SUB_ROWS:
        row_tile = (row_tile // SUB_ROWS) * SUB_ROWS
    else:
        row_tile = max(pack, (row_tile // pack) * pack)
    return int(row_tile)


@functools.partial(jax.jit, static_argnames=("row_tile", "sub_rows"))
def _residual_ln_call(x, sub, gamma, beta, row_tile, sub_rows):
    B, S, D = x.shape
    rows = B * S

    x2 = x.reshape(rows, D)
    sub2 = sub.reshape(rows, D)
    gamma2 = gamma.astype(jnp.float32).reshape(1, D)
    beta2 = beta.astype(jnp.float32).reshape(1, D)

    n_sub = row_tile // sub_rows
    grid = (pl.cdiv(rows, row_tile),)  # no padding: last block boundary-masked

    # VMEM limit sized to the actual buffered bytes (+headroom):
    #   double-buffered I/O in input dtype + f32 sub-block temporaries + params.
    itemsize = jnp.dtype(x.dtype).itemsize
    working = 2 * 3 * row_tile * D * itemsize + 3 * sub_rows * D * 4 + 4 * D * 4
    vmem_cap = _vmem_capacity_bytes()
    vmem_limit = int(min(0.90 * vmem_cap, 1.25 * working + (2 << 20)))
    vmem_limit = max(vmem_limit, 16 << 20)

    out2 = pl.pallas_call(
        _make_kernel(sub_rows, n_sub),
        out_shape=jax.ShapeDtypeStruct((rows, D), x.dtype),
        grid_spec=pltpu.PrefetchScalarGridSpec(
            num_scalar_prefetch=0,
            grid=grid,
            in_specs=[
                pl.BlockSpec((1, D), lambda i: (0, 0)),         # gamma (resident)
                pl.BlockSpec((1, D), lambda i: (0, 0)),         # beta  (resident)
                pl.BlockSpec((row_tile, D), lambda i: (i, 0)),  # x rows
                pl.BlockSpec((row_tile, D), lambda i: (i, 0)),  # sub rows
            ],
            out_specs=pl.BlockSpec((row_tile, D), lambda i: (i, 0)),
        ),
        compiler_params=pltpu.CompilerParams(
            dimension_semantics=("parallel",),   # megacore sharding on v7x
            vmem_limit_bytes=vmem_limit,
        ),
    )(gamma2, beta2, x2, sub2)

    return out2.reshape(B, S, D)


def residual_connection_layer(x, sub, gamma, beta, *, row_tile=None):
    """out = LayerNorm(x + dropout(sub)); dropout in eval mode (identity).

    x, sub: (batch, seq, dim_model); gamma, beta: (dim_model,)
    """
    B, S, D = x.shape
    if row_tile is None:
        row_tile = _pick_row_tile(B * S, D, x.dtype)
    row_tile = int(row_tile)
    sub_rows = min(row_tile, SUB_ROWS)
    if row_tile % sub_rows != 0:
        sub_rows = row_tile  # caller-provided odd tile: single sub-block
    return _residual_ln_call(x, sub, gamma, beta, row_tile, sub_rows)


def _reference(x, sub, gamma, beta):
    y = x + sub
    mean = jnp.mean(y, axis=-1, keepdims=True)
    var = jnp.mean((y - mean) ** 2, axis=-1, keepdims=True)
    return (y - mean) * lax.rsqrt(var + LN_EPS) * gamma + beta


if __name__ == "__main__":
    key = jax.random.PRNGKey(0)
    k1, k2 = jax.random.split(key)

    batch, seq, dim_model = 2, 8, 32
    x = jax.random.normal(k1, (batch, seq, dim_model), dtype=jnp.float32)
    sub = jax.random.normal(k2, (batch, seq, dim_model), dtype=jnp.float32)

    # nn.LayerNorm(dim_model) default init: weight=1, bias=0
    gamma = jnp.ones((dim_model,), dtype=jnp.float32)
    beta = jnp.zeros((dim_model,), dtype=jnp.float32)

    out = jax.block_until_ready(residual_connection_layer(x, sub, gamma, beta))
    ref = _reference(x, sub, gamma, beta)
    assert out.shape == (batch, seq, dim_model)
    assert jnp.allclose(out, ref, atol=1e-5, rtol=1e-5), "mismatch vs reference"

    # Larger, non-divisible shape: exercises boundary masking (no pad/slice copies).
    k3, k4 = jax.random.split(k2)
    xb = jax.random.normal(k3, (3, 37, 256), dtype=jnp.float32)
    sb = jax.random.normal(k4, (3, 37, 256), dtype=jnp.float32)
    gb = jnp.ones((256,), jnp.float32)
    bb = jnp.zeros((256,), jnp.float32)
    outb = jax.block_until_ready(residual_connection_layer(xb, sb, gb, bb))
    refb = _reference(xb, sb, gb, bb)
    assert jnp.allclose(outb, refb, atol=1e-5, rtol=1e-5), "mismatch vs reference (masked case)"

    print("KERNEL_OK")
</pallas_src>

<mosaic_0001>
module attributes {stable_mosaic.version = 11 : i64} {
  func.func @kernel(%arg0: i32, %arg1: memref<1x32xf32, #tpu.memory_space<vmem>>, %arg2: memref<1x32xf32, #tpu.memory_space<vmem>>, %arg3: memref<16x32xf32, #tpu.memory_space<vmem>>, %arg4: memref<16x32xf32, #tpu.memory_space<vmem>>, %arg5: memref<16x32xf32, #tpu.memory_space<vmem>>) attributes {dimension_semantics = [#tpu.dimension_semantics<parallel>], iteration_bounds = array<i64: 1>, scalar_prefetch = 0 : i64, scratch_operands = 0 : i64, tpu.core_type = #tpu.core_type<tc>, window_params = [{pipeline_mode = #tpu.pipeline_mode<synchronous>, transform_indices = @transform_0, window_bounds = array<i64: 1, 32>}, {pipeline_mode = #tpu.pipeline_mode<synchronous>, transform_indices = @transform_1, window_bounds = array<i64: 1, 32>}, {transform_indices = @transform_2, window_bounds = array<i64: 16, 32>}, {transform_indices = @transform_3, window_bounds = array<i64: 16, 32>}, {transform_indices = @transform_4, window_bounds = array<i64: 16, 32>}]} {
    %c0 = arith.constant 0 : index
    %c0_0 = arith.constant 0 : index
    %0 = vector.load %arg1[%c0, %c0_0] : memref<1x32xf32, #tpu.memory_space<vmem>>, vector<1x32xf32>
    %c0_1 = arith.constant 0 : index
    %c0_2 = arith.constant 0 : index
    %1 = vector.load %arg2[%c0_1, %c0_2] : memref<1x32xf32, #tpu.memory_space<vmem>>, vector<1x32xf32>
    %c0_3 = arith.constant 0 : index
    %c0_4 = arith.constant 0 : index
    %2 = vector.load %arg3[%c0_3, %c0_4] : memref<16x32xf32, #tpu.memory_space<vmem>>, vector<16x32xf32>
    %c0_5 = arith.constant 0 : index
    %c0_6 = arith.constant 0 : index
    %3 = vector.load %arg4[%c0_5, %c0_6] : memref<16x32xf32, #tpu.memory_space<vmem>>, vector<16x32xf32>
    %4 = arith.addf %2, %3 : vector<16x32xf32>
    %cst = arith.constant dense<0.000000e+00> : vector<16xf32>
    %5 = vector.multi_reduction <add>, %4, %cst [1] : vector<16x32xf32> to vector<16xf32>
    %6 = vector.shape_cast %5 : vector<16xf32> to vector<16x1xf32>
    %cst_7 = arith.constant 3.125000e-02 : f32
    %7 = vector.broadcast %cst_7 : f32 to vector<16x1xf32>
    %8 = arith.mulf %6, %7 : vector<16x1xf32>
    %9 = vector.broadcast %8 : vector<16x1xf32> to vector<16x32xf32>
    %10 = arith.subf %4, %9 : vector<16x32xf32>
    %11 = arith.mulf %10, %10 : vector<16x32xf32>
    %cst_8 = arith.constant dense<0.000000e+00> : vector<16xf32>
    %12 = vector.multi_reduction <add>, %11, %cst_8 [1] : vector<16x32xf32> to vector<16xf32>
    %13 = vector.shape_cast %12 : vector<16xf32> to vector<16x1xf32>
    %cst_9 = arith.constant 3.125000e-02 : f32
    %14 = vector.broadcast %cst_9 : f32 to vector<16x1xf32>
    %15 = arith.mulf %13, %14 : vector<16x1xf32>
    %cst_10 = arith.constant 9.99999974E-6 : f32
    %16 = vector.broadcast %cst_10 : f32 to vector<16x1xf32>
    %17 = arith.addf %15, %16 : vector<16x1xf32>
    %18 = math.rsqrt %17 : vector<16x1xf32>
    %19 = vector.broadcast %18 : vector<16x1xf32> to vector<16x32xf32>
    %20 = vector.broadcast %0 : vector<1x32xf32> to vector<16x32xf32>
    %21 = arith.mulf %19, %20 : vector<16x32xf32>
    %22 = arith.mulf %10, %21 : vector<16x32xf32>
    %23 = vector.broadcast %1 : vector<1x32xf32> to vector<16x32xf32>
    %24 = arith.addf %22, %23 : vector<16x32xf32>
    %c0_11 = arith.constant 0 : index
    %c0_12 = arith.constant 0 : index
    %25 = vector.load %arg5[%c0_11, %c0_12] : memref<16x32xf32, #tpu.memory_space<vmem>>, vector<16x32xf32>
    tpu.vector_store %arg5[%c0_11, %c0_12], %24 {strides = array<i32>} : memref<16x32xf32, #tpu.memory_space<vmem>>, vector<16x32xf32>,
    return
  }
  func.func @transform_0(%arg0: i32) -> (i32, i32) {
    %c0_i32 = arith.constant 0 : i32
    %c0_i32_0 = arith.constant 0 : i32
    %c0_i32_1 = arith.constant 0 : i32
    return %c0_i32, %c0_i32_0 : i32, i32
  }
  func.func @transform_1(%arg0: i32) -> (i32, i32) {
    %c0_i32 = arith.constant 0 : i32
    %c0_i32_0 = arith.constant 0 : i32
    %c0_i32_1 = arith.constant 0 : i32
    return %c0_i32, %c0_i32_0 : i32, i32
  }
  func.func @transform_2(%arg0: i32) -> (i32, i32) {
    %c0_i32 = arith.constant 0 : i32
    %c0_i32_0 = arith.constant 0 : i32
    return %arg0, %c0_i32 : i32, i32
  }
  func.func @transform_3(%arg0: i32) -> (i32, i32) {
    %c0_i32 = arith.constant 0 : i32
    %c0_i32_0 = arith.constant 0 : i32
    return %arg0, %c0_i32 : i32, i32
  }
  func.func @transform_4(%arg0: i32) -> (i32, i32) {
    %c0_i32 = arith.constant 0 : i32
    %c0_i32_0 = arith.constant 0 : i32
    return %arg0, %c0_i32 : i32, i32
  }
}

</mosaic_0001>

<bundles_post_ra>
// kernel: _residual_ln_call.1
= control target key start
LH: loop header
LB: loop body
LE: loop exit
PB: predicated region body
PF: predicated region fallthrough
CT: control target
= control target key end

     0   :  { %9 = vsyncpa [#allocation3], 0  ;;  %s254_s0 = inlined_call_operand.vmem [shape: f32[1,32], index: 0, kind: input, shape index: {}]   ;;  %s255_s1 = inlined_call_operand.vmem [shape: f32[1,32], index: 1, kind: input, shape index: {}]   ;;  %s256_s2 = inlined_call_operand.hbm [shape: f32[16,32], index: 2, kind: input, shape index: {}]   ;;  %s257_s3 = inlined_call_operand.hbm [shape: f32[16,32], index: 3, kind: input, shape index: {}]   ;;  %s258_s4 = inlined_call_operand.hbm [shape: f32[16,32], index: 4, kind: output, shape index: {}]  }
   0x1   :  { %10 = vsyncpa [#allocation6], 0 }
   0x2   :  { %11 = vsyncpa [#allocation4], 0  ;;  %s194_s15 = smov [#allocation2]  }
   0x3   :  { %s21_s16 = sshll.u32 %s194_s15, 4  ;;  %s22_s16 = int_to_ptr.vmem [resolvable:$true] %s21_s16 }
   0x4   :  { %s136_s17 = scalar_lea.vmem %s22_s16, 256  ;;  %p141_p1 = scmp.lt.s32.totalorder %s22_s16, %s22_s16 }
   0x5   :  { %p137_p0 = scmp.ne.s32.totalorder %s22_s16, %s136_s17  ;;  %p142_p2 = scmp.lt.s32.totalorder %s136_s17, %s136_s17 }
   0x7   :  { %p143_p3 = por %p142_p2, %p141_p1 }
   0x9   :  { %p144_p4 = pnand %p143_p3, %p137_p0 }
   0xb   :  { %147 = shalt.err (!%p144_p4)
}
   0xc   :  { %s195_s18 = smov 128   ;;  %s196_s19 = smov 8  }
   0xd   :  { %27 = dma.hbm_to_vmem [thread:$0]  %s256_s2, 256, %s22_s16, [#allocation3], %s195_s18, %s195_s18, %s196_s19  }
   0xe   :  { %s197_s22 = smov [#allocation5]  }
   0xf   :  { %s33_s23 = sshll.u32 %s197_s22, 4  ;;  %s34_s23 = int_to_ptr.vmem [resolvable:$true] %s33_s23 }
  0x10   :  { %s156_s24 = scalar_lea.vmem %s34_s23, 256  ;;  %p161_p6 = scmp.lt.s32.totalorder %s34_s23, %s34_s23 }
  0x11   :  { %p157_p5 = scmp.ne.s32.totalorder %s34_s23, %s156_s24  ;;  %p162_p7 = scmp.lt.s32.totalorder %s156_s24, %s156_s24 }
  0x13   :  { %p163_p8 = por %p162_p7, %p161_p6 }
  0x15   :  { %p164_p9 = pnand %p163_p8, %p157_p5 }
  0x17   :  { %167 = shalt.err (!%p164_p9)
}
  0x18   :  { %39 = dma.hbm_to_vmem [thread:$0]  %s257_s3, 256, %s34_s23, [#allocation6], %s195_s18, %s195_s18, %s196_s19  }
  0x19   :  { %188 = dma.done.wait [#allocation3], 256  }
  0x1a   :  { %189 = vsyncadd [#allocation3], 4294967040 }
  0x1b   :  { %190 = dma.done.wait [#allocation6], 256  }
  0x1c   :  { %191 = vsyncadd [#allocation6], 4294967040  ;;  %v48_v0 = vld [vmem:[#allocation2] sm:$0xff]  ;;  %v50_v1 = vld [vmem:[#allocation5] sm:$0xff]  ;;  %vm54_vm0 = vcmask 261120   ;;  %s198_s29 = smov [#allocation7]  }
  0x1d   :  { %v49_v2 = vld [vmem:[#allocation2 + $0x8] sm:$0xff]  ;;  %v52_v3 = vadd.f32 %v50_v1, %v48_v0  ;;  %v51_v4 = vld [vmem:[#allocation5 + $0x8] sm:$0xff]  ;;  %v117_v24 = vld [vmem:[%s254_s0] ss:$0 sm:$0xff]  ;;  %s104_s30 = sshll.u32 %s198_s29, 4  ;;  %s105_s30 = int_to_ptr.vmem [resolvable:$true] %s104_s30 }
  0x1e   :  { %v53_v5 = vadd.f32 %v51_v4, %v49_v2  ;;  %v118_v27 = vld [vmem:[%s255_s1] ss:$0 sm:$0xff]  ;;  %s168_s0 = scalar_lea.vmem %s105_s30, 256  ;;  %p173_p11 = scmp.lt.s32.totalorder %s105_s30, %s105_s30 }
  0x1f   :  { %v55_v6 = vsel %vm54_vm0, %v52_v3, 0.0  ;;  %p169_p10 = scmp.ne.s32.totalorder %s105_s30, %s168_s0  ;;  %p174_p12 = scmp.lt.s32.totalorder %s168_s0, %s168_s0 }
  0x20   :  { %56 = vadd.xlane.f32.xlu0 %v55_v6  ;;  %v58_v7 = vsel %vm54_vm0, %v53_v5, 0.0 }
  0x21   :  { %p175_p13 = por %p174_p12, %p173_p11 }
  0x23   :  { %p176_p0 = pnand %p175_p13, %p169_p10 }
  0x24   :  { %59 = vadd.xlane.f32.xlu0 %v58_v7 }
  0xa9   :  { %v57_v8 = vpop.xlane.xlu0 %56 }
  0xaa   :  { %v61_v9 = vmul.f32 0.03125, %v57_v8 }
  0xac   :  { %v63_v10 = vsub.f32 %v52_v3, %v61_v9 }
  0xad   :  { %v60_v11 = vpop.xlane.xlu0 %59 }
  0xae   :  { %v62_v12 = vmul.f32 0.03125, %v60_v11  ;;  %v65_v13 = vmul.f32 %v63_v10, %v63_v10 }
  0xb0   :  { %v64_v14 = vsub.f32 %v53_v5, %v62_v12  ;;  %v67_v15 = vsel %vm54_vm0, %v65_v13, 0.0 }
  0xb1   :  { %68 = vadd.xlane.f32.xlu1 %v67_v15 }
  0xb2   :  { %v66_v16 = vmul.f32 %v64_v14, %v64_v14 }
  0xb4   :  { %v70_v17 = vsel %vm54_vm0, %v66_v16, 0.0 }
  0xb5   :  { %71 = vadd.xlane.f32.xlu1 %v70_v17 }
 0x13a   :  { %v69_v18 = vpop.xlane.xlu1 %68 }
 0x13b   :  { %v73_v19 = vmul.f32 0.03125, %v69_v18 }
 0x13d   :  { %v75_v20 = vadd.f32 1e-05, %v73_v19 }
 0x13e   :  { %v72_v21 = vpop.xlane.xlu1 %71 }
 0x13f   :  { %124 = vrsqrt.f32 %v75_v20  ;;  %v74_v22 = vmul.f32 0.03125, %v72_v21 }
 0x141   :  { %v76_v23 = vadd.f32 1e-05, %v74_v22 }
 0x143   :  { %126 = vrsqrt.f32 %v76_v23 }
 0x14c   :  { %v125_v25 = vpop.eup %124 }
 0x14d   :  { %v85_v26 = vmul.f32 %v125_v25, %v117_v24 }
 0x14f   :  { %v87_v28 = vmul.f32 %v85_v26, %v63_v10 }
 0x150   :  { %v127_v29 = vpop.eup %126 }
 0x151   :  { %v86_v30 = vmul.f32 %v127_v29, %v117_v24  ;;  %v95_v31 = vadd.f32 %v118_v27, %v87_v28 }
 0x153   :  { %v88_v32 = vmul.f32 %v86_v30, %v64_v14  ;;  %97 = vst.msk [vmem:[#allocation7] sm:$0xff] %vm54_vm0, %v95_v31 }
 0x155   :  { %v96_v33 = vadd.f32 %v118_v27, %v88_v32 }
 0x157   :  { %98 = vst.msk [vmem:[#allocation7 + $0x8] sm:$0xff] %vm54_vm0, %v96_v33 }
 0x158   :  { %179 = shalt.err (!%p176_p0)
}
 0x159   :  { %110 = dma.vmem_to_hbm [thread:$0]  %s105_s30, 256, %s258_s4, [#allocation4], %s195_s18, %s195_s18, %s196_s19  }
 0x15a   :  { %192 = dma.done.wait [#allocation4], 256  }
 0x15b   :  { %193 = vsyncadd [#allocation4], 4294967040 }
 0x15c   :  { %114 = vsyncpa [#allocation3], 1 }
 0x15d   :  { %115 = vsyncpa [#allocation6], 1 }
 0x15e   :  { %116 = vsyncpa [#allocation4], 1 }

</bundles_post_ra>
